<compile_context>
chip_gen: v7x
topology: tpu7x:2x2x1
jax: 0.10.0
libtpu: 0.0.40
codegen_flags: <defaults>
</compile_context>

<pallas_src>
import jax
import jax.numpy as jnp
from jax.experimental import pallas as pl
from jax.experimental.pallas import tpu as pltpu


# ----------------------------------------------------------------------------- kernel
def head_kernel(img_ref, pt_ref, mesh_ref, w1t_ref, b1_ref, w2t_ref, b2_ref,
                o_img_ref, o_pt_ref, o_mesh_ref):
    # img/pt/mesh_ref : (B, 512)      f32   (cast to compute dtype on the VPU, free)
    # w1t_ref         : (512, 256)    compute dtype (bf16 by default)
    # b1_ref          : (1, 256)      f32
    # w2t_ref         : (256, C_pad)  compute dtype, C padded to 128 lanes with zeros
    # b2_ref          : (1, C_pad)    f32, padded with zeros
    # o_*_ref         : (B, C_pad)    f32   (lane-dense unmasked stores)
    w1 = w1t_ref[...]
    b1 = b1_ref[...]
    w2 = w2t_ref[...]
    b2 = b2_ref[...]
    compute_dtype = w1.dtype

    def apply_head(x_ref, o_ref):
        x = x_ref[...].astype(compute_dtype)
        # Linear(512 -> 256): MXU matmul, f32 accumulation; bias + ReLU in f32 on VPU.
        h = jnp.dot(x, w1, preferred_element_type=jnp.float32)
        h = jnp.maximum(h + b1, 0.0)
        # Linear(256 -> C_pad): cast activations back to the matmul dtype for the MXU.
        y = jnp.dot(h.astype(compute_dtype), w2, preferred_element_type=jnp.float32)
        o_ref[...] = (y + b2).astype(o_ref.dtype)

    apply_head(img_ref, o_img_ref)
    apply_head(pt_ref, o_pt_ref)
    apply_head(mesh_ref, o_mesh_ref)


# ---------------------------------------------------------------------------- helpers
def _round_up(x, m):
    return ((x + m - 1) // m) * m


def init_head_params(key, num_classes, dtype=jnp.float32):
    """Deterministic init matching nn.Linear shapes: W1 (256,512), W2 (C,256)."""
    k1, k2, k3, k4 = jax.random.split(key, 4)
    bound1 = 1.0 / jnp.sqrt(512.0)
    bound2 = 1.0 / jnp.sqrt(256.0)
    w1 = jax.random.uniform(k1, (256, 512), dtype, -bound1, bound1)
    b1 = jax.random.uniform(k2, (256,), dtype, -bound1, bound1)
    w2 = jax.random.uniform(k3, (num_classes, 256), dtype, -bound2, bound2)
    b2 = jax.random.uniform(k4, (num_classes,), dtype, -bound2, bound2)
    # Transposed weights / 2-D biases (lane-major layout for the kernel).
    return (w1.T, b1.reshape(1, 256), w2.T, b2.reshape(1, num_classes))


def prepare_head_params(params, *, compute_dtype=jnp.bfloat16):
    """One-time weight prep: cast to the MXU compute dtype and lane-pad layer 2 to 128.

    Do this ONCE (outside the per-step call path); the results are passed straight into
    the pallas_call so no per-call cast/pad HBM traffic remains.
    """
    w1t, b1, w2t, b2 = params          # (512,256), (1,256), (256,C), (1,C) — all f32
    C = w2t.shape[1]
    c_pad = _round_up(C, 128)          # lane-dense output width
    w1t_c = jnp.asarray(w1t, compute_dtype)
    b1_f = jnp.asarray(b1, jnp.float32)
    w2t_p = jnp.pad(jnp.asarray(w2t, jnp.float32), ((0, 0), (0, c_pad - C))).astype(compute_dtype)
    b2_p = jnp.pad(jnp.asarray(b2, jnp.float32), ((0, 0), (0, c_pad - C)))
    return (w1t_c, b1_f, w2t_p, b2_p)


def corrnet_head(img_feat, pt_feat, mesh_feat, prepared, num_classes):
    """Shared head applied to the three modality features (runs inside jit)."""
    w1t_c, b1_f, w2t_p, b2_p = prepared
    B, D = img_feat.shape
    H = w1t_c.shape[1]
    c_pad = w2t_p.shape[1]

    flops = 3 * 2 * B * (D * H + H * c_pad)
    bytes_accessed = (3 * B * D * img_feat.dtype.itemsize
                      + w1t_c.size * w1t_c.dtype.itemsize
                      + w2t_p.size * w2t_p.dtype.itemsize
                      + b1_f.size * 4 + b2_p.size * 4
                      + 3 * B * c_pad * 4)

    vmem = pl.BlockSpec(memory_space=pltpu.MemorySpace.VMEM)
    out_shape = tuple(jax.ShapeDtypeStruct((B, c_pad), jnp.float32) for _ in range(3))

    img_out, pt_out, mesh_out = pl.pallas_call(
        head_kernel,
        out_shape=out_shape,
        in_specs=[vmem] * 7,
        out_specs=(vmem, vmem, vmem),
        cost_estimate=pl.CostEstimate(
            flops=flops, transcendentals=0, bytes_accessed=bytes_accessed),
    )(img_feat, pt_feat, mesh_feat, w1t_c, b1_f, w2t_p, b2_p)

    # Padded lanes are exactly zero (W2/b2 padded with zeros); slices fuse under jit.
    return (img_out[:, :num_classes],
            pt_out[:, :num_classes],
            mesh_out[:, :num_classes])


def make_corrnet_forward(params, num_classes, *, compute_dtype=jnp.bfloat16):
    """Builds a jitted forward reproducing CorrNet.forward given backbone features.

    Returns a callable (img_feat, pt_feat, mesh_feat) ->
      (img_pred, pt_pred, mesh_pred, img_feat, pt_feat, mesh_feat)   [PyTorch ordering]
    """
    prepared = prepare_head_params(params, compute_dtype=compute_dtype)

    @jax.jit
    def forward(img_feat, pt_feat, mesh_feat):
        img_pred, pt_pred, mesh_pred = corrnet_head(
            img_feat, pt_feat, mesh_feat, prepared, num_classes)
        return img_pred, pt_pred, mesh_pred, img_feat, pt_feat, mesh_feat

    return forward


def reference_head(x, params, compute_dtype):
    """Plain-JAX reference with the same operand-dtype / f32-accumulate recipe."""
    w1t, b1, w2t, b2 = params
    h = jnp.dot(x.astype(compute_dtype), w1t.astype(compute_dtype),
                preferred_element_type=jnp.float32)
    h = jnp.maximum(h + b1.astype(jnp.float32), 0.0)
    y = jnp.dot(h.astype(compute_dtype), w2t.astype(compute_dtype),
                preferred_element_type=jnp.float32)
    return y + b2.astype(jnp.float32)


# ------------------------------------------------------------------------------- main
if __name__ == "__main__":
    key = jax.random.PRNGKey(0)
    k_feat, k_param = jax.random.split(key)
    B = 2
    NUM_CLASSES = 10

    # Placeholder backbone outputs (512-d features per modality).
    kf1, kf2, kf3 = jax.random.split(k_feat, 3)
    img_feat = jax.random.normal(kf1, (B, 512), jnp.float32)
    pt_feat = jax.random.normal(kf2, (B, 512), jnp.float32)
    mesh_feat = jax.random.normal(kf3, (B, 512), jnp.float32)

    params = init_head_params(k_param, NUM_CLASSES)
    forward = make_corrnet_forward(params, NUM_CLASSES, compute_dtype=jnp.bfloat16)

    outs = forward(img_feat, pt_feat, mesh_feat)
    outs = jax.block_until_ready(outs)
    img_pred, pt_pred, mesh_pred = outs[0], outs[1], outs[2]

    # Correctness vs. a plain-JAX reference of the head (same precision recipe).
    ref_img = reference_head(img_feat, params, jnp.bfloat16)
    ref_pt = reference_head(pt_feat, params, jnp.bfloat16)
    ref_mesh = reference_head(mesh_feat, params, jnp.bfloat16)

    assert img_pred.shape == (B, NUM_CLASSES)
    assert pt_pred.shape == (B, NUM_CLASSES)
    assert mesh_pred.shape == (B, NUM_CLASSES)
    assert jnp.allclose(img_pred, ref_img, atol=1e-3, rtol=1e-3)
    assert jnp.allclose(pt_pred, ref_pt, atol=1e-3, rtol=1e-3)
    assert jnp.allclose(mesh_pred, ref_mesh, atol=1e-3, rtol=1e-3)

    # Pass-through features must be untouched.
    assert jnp.array_equal(outs[3], img_feat)
    assert jnp.array_equal(outs[4], pt_feat)
    assert jnp.array_equal(outs[5], mesh_feat)

    # Sanity check against a pure-f32 reference (bf16 operand error should be small).
    w1t, b1, w2t, b2 = params
    f32_ref = jnp.maximum(img_feat @ w1t + b1, 0.0) @ w2t + b2
    assert jnp.allclose(img_pred, f32_ref, atol=5e-2)

    print("KERNEL_OK")
</pallas_src>

<mosaic_0001>
module attributes {stable_mosaic.version = 11 : i64} {
  func.func @head_kernel(%arg0: memref<2x512xf32, #tpu.memory_space<vmem>>, %arg1: memref<2x512xf32, #tpu.memory_space<vmem>>, %arg2: memref<2x512xf32, #tpu.memory_space<vmem>>, %arg3: memref<512x256xbf16, #tpu.memory_space<vmem>>, %arg4: memref<1x256xf32, #tpu.memory_space<vmem>>, %arg5: memref<256x128xbf16, #tpu.memory_space<vmem>>, %arg6: memref<1x128xf32, #tpu.memory_space<vmem>>, %arg7: memref<2x128xf32, #tpu.memory_space<vmem>>, %arg8: memref<2x128xf32, #tpu.memory_space<vmem>>, %arg9: memref<2x128xf32, #tpu.memory_space<vmem>>) attributes {dimension_semantics = [], scalar_prefetch = 0 : i64, scratch_operands = 0 : i64, tpu.core_type = #tpu.core_type<tc>} {
    %c0 = arith.constant 0 : index
    %c0_0 = arith.constant 0 : index
    %0 = vector.load %arg3[%c0, %c0_0] : memref<512x256xbf16, #tpu.memory_space<vmem>>, vector<512x256xbf16>
    %c0_1 = arith.constant 0 : index
    %c0_2 = arith.constant 0 : index
    %1 = vector.load %arg4[%c0_1, %c0_2] : memref<1x256xf32, #tpu.memory_space<vmem>>, vector<1x256xf32>
    %c0_3 = arith.constant 0 : index
    %c0_4 = arith.constant 0 : index
    %2 = vector.load %arg5[%c0_3, %c0_4] : memref<256x128xbf16, #tpu.memory_space<vmem>>, vector<256x128xbf16>
    %c0_5 = arith.constant 0 : index
    %c0_6 = arith.constant 0 : index
    %3 = vector.load %arg6[%c0_5, %c0_6] : memref<1x128xf32, #tpu.memory_space<vmem>>, vector<1x128xf32>
    %c0_7 = arith.constant 0 : index
    %c0_8 = arith.constant 0 : index
    %4 = vector.load %arg0[%c0_7, %c0_8] : memref<2x512xf32, #tpu.memory_space<vmem>>, vector<2x512xf32>
    %5 = arith.truncf %4 : vector<2x512xf32> to vector<2x512xbf16>
    %cst = arith.constant dense<0.000000e+00> : vector<2x256xf32>
    %6 = tpu.matmul %5, %0, %cst {dimension_numbers = #tpu.dot_dimension_numbers<[1], [0], [0], [1], [0, 0, 1, 1], [], []>} : vector<2x512xbf16>, vector<512x256xbf16>, vector<2x256xf32> -> vector<2x256xf32>
    %7 = vector.broadcast %1 : vector<1x256xf32> to vector<2x256xf32>
    %8 = arith.addf %6, %7 : vector<2x256xf32>
    %cst_9 = arith.constant 0.000000e+00 : f32
    %9 = vector.broadcast %cst_9 : f32 to vector<2x256xf32>
    %10 = arith.maximumf %8, %9 : vector<2x256xf32>
    %11 = arith.truncf %10 : vector<2x256xf32> to vector<2x256xbf16>
    %cst_10 = arith.constant dense<0.000000e+00> : vector<2x128xf32>
    %12 = tpu.matmul %11, %2, %cst_10 {dimension_numbers = #tpu.dot_dimension_numbers<[1], [0], [0], [1], [0, 0, 1, 1], [], []>} : vector<2x256xbf16>, vector<256x128xbf16>, vector<2x128xf32> -> vector<2x128xf32>
    %13 = vector.broadcast %3 : vector<1x128xf32> to vector<2x128xf32>
    %14 = arith.addf %12, %13 : vector<2x128xf32>
    %c0_11 = arith.constant 0 : index
    %c0_12 = arith.constant 0 : index
    %15 = vector.load %arg7[%c0_11, %c0_12] : memref<2x128xf32, #tpu.memory_space<vmem>>, vector<2x128xf32>
    tpu.vector_store %arg7[%c0_11, %c0_12], %14 {strides = array<i32>} : memref<2x128xf32, #tpu.memory_space<vmem>>, vector<2x128xf32>,
    %c0_13 = arith.constant 0 : index
    %c0_14 = arith.constant 0 : index
    %16 = vector.load %arg1[%c0_13, %c0_14] : memref<2x512xf32, #tpu.memory_space<vmem>>, vector<2x512xf32>
    %17 = arith.truncf %16 : vector<2x512xf32> to vector<2x512xbf16>
    %cst_15 = arith.constant dense<0.000000e+00> : vector<2x256xf32>
    %18 = tpu.matmul %17, %0, %cst_15 {dimension_numbers = #tpu.dot_dimension_numbers<[1], [0], [0], [1], [0, 0, 1, 1], [], []>} : vector<2x512xbf16>, vector<512x256xbf16>, vector<2x256xf32> -> vector<2x256xf32>
    %19 = vector.broadcast %1 : vector<1x256xf32> to vector<2x256xf32>
    %20 = arith.addf %18, %19 : vector<2x256xf32>
    %cst_16 = arith.constant 0.000000e+00 : f32
    %21 = vector.broadcast %cst_16 : f32 to vector<2x256xf32>
    %22 = arith.maximumf %20, %21 : vector<2x256xf32>
    %23 = arith.truncf %22 : vector<2x256xf32> to vector<2x256xbf16>
    %cst_17 = arith.constant dense<0.000000e+00> : vector<2x128xf32>
    %24 = tpu.matmul %23, %2, %cst_17 {dimension_numbers = #tpu.dot_dimension_numbers<[1], [0], [0], [1], [0, 0, 1, 1], [], []>} : vector<2x256xbf16>, vector<256x128xbf16>, vector<2x128xf32> -> vector<2x128xf32>
    %25 = vector.broadcast %3 : vector<1x128xf32> to vector<2x128xf32>
    %26 = arith.addf %24, %25 : vector<2x128xf32>
    %c0_18 = arith.constant 0 : index
    %c0_19 = arith.constant 0 : index
    %27 = vector.load %arg8[%c0_18, %c0_19] : memref<2x128xf32, #tpu.memory_space<vmem>>, vector<2x128xf32>
    tpu.vector_store %arg8[%c0_18, %c0_19], %26 {strides = array<i32>} : memref<2x128xf32, #tpu.memory_space<vmem>>, vector<2x128xf32>,
    %c0_20 = arith.constant 0 : index
    %c0_21 = arith.constant 0 : index
    %28 = vector.load %arg2[%c0_20, %c0_21] : memref<2x512xf32, #tpu.memory_space<vmem>>, vector<2x512xf32>
    %29 = arith.truncf %28 : vector<2x512xf32> to vector<2x512xbf16>
    %cst_22 = arith.constant dense<0.000000e+00> : vector<2x256xf32>
    %30 = tpu.matmul %29, %0, %cst_22 {dimension_numbers = #tpu.dot_dimension_numbers<[1], [0], [0], [1], [0, 0, 1, 1], [], []>} : vector<2x512xbf16>, vector<512x256xbf16>, vector<2x256xf32> -> vector<2x256xf32>
    %31 = vector.broadcast %1 : vector<1x256xf32> to vector<2x256xf32>
    %32 = arith.addf %30, %31 : vector<2x256xf32>
    %cst_23 = arith.constant 0.000000e+00 : f32
    %33 = vector.broadcast %cst_23 : f32 to vector<2x256xf32>
    %34 = arith.maximumf %32, %33 : vector<2x256xf32>
    %35 = arith.truncf %34 : vector<2x256xf32> to vector<2x256xbf16>
    %cst_24 = arith.constant dense<0.000000e+00> : vector<2x128xf32>
    %36 = tpu.matmul %35, %2, %cst_24 {dimension_numbers = #tpu.dot_dimension_numbers<[1], [0], [0], [1], [0, 0, 1, 1], [], []>} : vector<2x256xbf16>, vector<256x128xbf16>, vector<2x128xf32> -> vector<2x128xf32>
    %37 = vector.broadcast %3 : vector<1x128xf32> to vector<2x128xf32>
    %38 = arith.addf %36, %37 : vector<2x128xf32>
    %c0_25 = arith.constant 0 : index
    %c0_26 = arith.constant 0 : index
    %39 = vector.load %arg9[%c0_25, %c0_26] : memref<2x128xf32, #tpu.memory_space<vmem>>, vector<2x128xf32>
    tpu.vector_store %arg9[%c0_25, %c0_26], %38 {strides = array<i32>} : memref<2x128xf32, #tpu.memory_space<vmem>>, vector<2x128xf32>,
    return
  }
}

</mosaic_0001>

<bundles_post_ra>
// kernel: forward.1
= control target key start
LH: loop header
LB: loop body
LE: loop exit
PB: predicated region body
PF: predicated region fallthrough
CT: control target
= control target key end

     0   :  { %15 = vsyncpa [#allocation3], 0  ;;  %v1418_v36 = vmov 1983009808   ;;  %v136_v38 = vlaneseq  ;;  %s2191_s0 = inlined_call_operand.vmem [shape: f32[2,512], index: 0, kind: input, shape index: {}]   ;;  %s2192_s1 = inlined_call_operand.vmem [shape: f32[2,512], index: 1, kind: input, shape index: {}]   ;;  %s2193_s2 = inlined_call_operand.vmem [shape: f32[2,512], index: 2, kind: input, shape index: {}]   ;;  %s2194_s3 = inlined_call_operand.vmem [shape: bf16[512,256], index: 3, kind: input, shape index: {}]   ;;  %s2195_s4 = inlined_call_operand.vmem [shape: f32[1,256], index: 4, kind: input, shape index: {}]   ;;  %s2196_s5 = inlined_call_operand.vmem [shape: bf16[256,128], index: 5, kind: input, shape index: {}]   ;;  %s2197_s6 = inlined_call_operand.vmem [shape: f32[1,128], index: 6, kind: input, shape index: {}]   ;;  %s2198_s7 = inlined_call_operand.hbm [shape: f32[2,128], index: 7, kind: output, shape index: {0}]   ;;  %s2199_s8 = inlined_call_operand.hbm [shape: f32[2,128], index: 8, kind: output, shape index: {1}]   ;;  %s2200_s9 = inlined_call_operand.hbm [shape: f32[2,128], index: 9, kind: output, shape index: {2}]  }
   0x1   :  { %v1475_v0 = vld [vmem:[%s2194_s3 + $0x4] ss:$8 sps:$4 sm:$0xff]   ;;  %v1486_v2 = vld [vmem:[%s2194_s3] ss:$8 sps:$4 sm:$0xff]   ;;  %v1497_v4 = vld [vmem:[%s2194_s3 + $0x14] ss:$8 sps:$4 sm:$0xff]   ;;  %v134_v37 = vunpack.c.l.s4 %v1418_v36 }
   0x2   :  { %v1480_v1 = vld [vmem:[%s2194_s3 + $0x104] ss:$8 sps:$4 sm:$0xff]   ;;  %488 = vmatprep.subr.bf16.mxu1 %v1475_v0  ;;  %v1491_v3 = vld [vmem:[%s2194_s3 + $0x100] ss:$8 sps:$4 sm:$0xff]   ;;  %v1504_v5 = vld [vmem:[%s2194_s3 + $0x114] ss:$8 sps:$4 sm:$0xff]  }
   0x3   :  { %529 = vmatprep.subr.bf16.mxu0 %v1480_v1  ;;  %489 = vmatpush1.bf16.msra.mxu1 %v1486_v2  ;;  %v1509_v6 = vld [vmem:[%s2194_s3 + $0x10] ss:$8 sps:$4 sm:$0xff]   ;;  %v1521_v8 = vld [vmem:[%s2194_s3 + $0x24] ss:$8 sps:$4 sm:$0xff]   ;;  %v1531_v10 = vld [vmem:[%s2194_s3 + $0x20] ss:$8 sps:$4 sm:$0xff]   ;;  %v135_v42 = vunpack.c.0.s8 %v134_v37 }
   0x4   :  { %530 = vmatpush1.bf16.msra.mxu0 %v1491_v3  ;;  %490 = vmatprep.subr.bf16.mxu1 %v1497_v4  ;;  %v1515_v7 = vld [vmem:[%s2194_s3 + $0x110] ss:$8 sps:$4 sm:$0xff]   ;;  %v1526_v9 = vld [vmem:[%s2194_s3 + $0x124] ss:$8 sps:$4 sm:$0xff]   ;;  %v1536_v11 = vld [vmem:[%s2194_s3 + $0x120] ss:$8 sps:$4 sm:$0xff]  }
   0x5   :  { %531 = vmatprep.subr.bf16.mxu0 %v1504_v5  ;;  %v1543_v12 = vld [vmem:[%s2194_s3 + $0x34] ss:$8 sps:$4 sm:$0xff]   ;;  %v1555_v14 = vld [vmem:[%s2194_s3 + $0x30] ss:$8 sps:$4 sm:$0xff]   ;;  %v1567_v16 = vld [vmem:[%s2194_s3 + $0x44] ss:$8 sps:$4 sm:$0xff]  }
   0x6   :  { %v1550_v13 = vld [vmem:[%s2194_s3 + $0x134] ss:$8 sps:$4 sm:$0xff]   ;;  %v1562_v15 = vld [vmem:[%s2194_s3 + $0x130] ss:$8 sps:$4 sm:$0xff]   ;;  %v1574_v17 = vld [vmem:[%s2194_s3 + $0x144] ss:$8 sps:$4 sm:$0xff]  }
   0x7   :  { %491 = vmatpush1.bf16.msra.mxu1 %v1509_v6  ;;  %v1579_v18 = vld [vmem:[%s2194_s3 + $0x40] ss:$8 sps:$4 sm:$0xff]   ;;  %v1591_v20 = vld [vmem:[%s2194_s3 + $0x54] ss:$8 sps:$4 sm:$0xff]   ;;  %v1603_v22 = vld [vmem:[%s2194_s3 + $0x50] ss:$8 sps:$4 sm:$0xff]  }
   0x8   :  { %532 = vmatpush1.bf16.msra.mxu0 %v1515_v7  ;;  %492 = vmatprep.subr.bf16.mxu1 %v1521_v8  ;;  %v1584_v19 = vld [vmem:[%s2194_s3 + $0x140] ss:$8 sps:$4 sm:$0xff]   ;;  %v1598_v21 = vld [vmem:[%s2194_s3 + $0x154] ss:$8 sps:$4 sm:$0xff]   ;;  %v1610_v23 = vld [vmem:[%s2194_s3 + $0x150] ss:$8 sps:$4 sm:$0xff]  }
   0x9   :  { %533 = vmatprep.subr.bf16.mxu0 %v1526_v9  ;;  %2261 = vst [vmem:[#allocation9_spill] sm:$0xff] %v1598_v21  ;;  %2262 = vst [vmem:[#allocation10_spill] sm:$0xff] %v1610_v23  ;;  %v1615_v24 = vld [vmem:[%s2194_s3 + $0x64] ss:$8 sps:$4 sm:$0xff]   ;;  %v1627_v26 = vld [vmem:[%s2194_s3 + $0x60] ss:$8 sps:$4 sm:$0xff]  }
   0xa   :  { %v1622_v25 = vld [vmem:[%s2194_s3 + $0x164] ss:$8 sps:$4 sm:$0xff]   ;;  %v1632_v27 = vld [vmem:[%s2194_s3 + $0x160] ss:$8 sps:$4 sm:$0xff]   ;;  %v1639_v28 = vld [vmem:[%s2194_s3 + $0x74] ss:$8 sps:$4 sm:$0xff]  }
   0xb   :  { %493 = vmatpush1.bf16.msra.mxu1 %v1531_v10  ;;  %2263 = vst [vmem:[#allocation11_spill] sm:$0xff] %v1622_v25  ;;  %2264 = vst [vmem:[#allocation12_spill] sm:$0xff] %v1632_v27  ;;  %v1646_v29 = vld [vmem:[%s2194_s3 + $0x174] ss:$8 sps:$4 sm:$0xff]   ;;  %v1651_v30 = vld [vmem:[%s2194_s3 + $0x70] ss:$8 sps:$4 sm:$0xff]  }
   0xc   :  { %534 = vmatpush1.bf16.msra.mxu0 %v1536_v11  ;;  %494 = vmatprep.subr.bf16.mxu1 %v1543_v12  ;;  %2265 = vst [vmem:[#allocation13_spill] sm:$0xff] %v1646_v29  ;;  %v1658_v31 = vld [vmem:[%s2194_s3 + $0x170] ss:$8 sps:$4 sm:$0xff]   ;;  %v1663_v32 = vld [vmem:[%s2194_s3 + $0x84] ss:$8 sps:$4 sm:$0xff]   ;;  %v1701_v43 = vshrl.u32 %v136_v38, 7 }
   0xd   :  { %535 = vmatprep.subr.bf16.mxu0 %v1550_v13  ;;  %2266 = vst [vmem:[#allocation14_spill] sm:$0xff] %v1658_v31  ;;  %v1670_v33 = vld [vmem:[%s2194_s3 + $0x184] ss:$8 sps:$4 sm:$0xff]   ;;  %v1675_v34 = vld [vmem:[%s2194_s3 + $0x80] ss:$8 sps:$4 sm:$0xff]  }
   0xe   :  { %2267 = vst [vmem:[#allocation15_spill] sm:$0xff] %v1670_v33  ;;  %v1680_v35 = vld [vmem:[%s2194_s3 + $0x180] ss:$8 sps:$4 sm:$0xff]   ;;  %v1687_v39 = vld [vmem:[%s2194_s3 + $0x94] ss:$8 sps:$4 sm:$0xff]   ;;  %v1733_v49 = vsub.s32 %v135_v42, %v1701_v43 }
   0xf   :  { %495 = vmatpush1.bf16.msra.mxu1 %v1555_v14  ;;  %2268 = vst [vmem:[#allocation16_spill] sm:$0xff] %v1680_v35  ;;  %v1694_v40 = vld [vmem:[%s2194_s3 + $0x194] ss:$8 sps:$4 sm:$0xff]   ;;  %v1699_v41 = vld [vmem:[%s2194_s3 + $0x90] ss:$8 sps:$4 sm:$0xff]   ;;  %v130_v53 = vld [vmem:[%s2191_s0] sm:$0xff] }
  0x10   :  { %536 = vmatpush1.bf16.msra.mxu0 %v1562_v15  ;;  %496 = vmatprep.subr.bf16.mxu1 %v1567_v16  ;;  %2269 = vst [vmem:[#allocation17_spill] sm:$0xff] %v1694_v40  ;;  %v1708_v44 = vld [vmem:[%s2194_s3 + $0x190] ss:$8 sps:$4 sm:$0xff]   ;;  %v1713_v45 = vld [vmem:[%s2194_s3 + $0xa4] ss:$8 sps:$4 sm:$0xff]   ;;  %v139_v55 = vrot.slane %v130_v53, %v1733_v49  ;;  %v132_v56 = vcombine.high %v130_v53, %v130_v53 }
  0x11   :  { %537 = vmatprep.subr.bf16.mxu0 %v1574_v17  ;;  %2270 = vst [vmem:[#allocation18_spill] sm:$0xff] %v1708_v44  ;;  %v1720_v46 = vld [vmem:[%s2194_s3 + $0x1a4] ss:$8 sps:$4 sm:$0xff]   ;;  %v1725_v47 = vld [vmem:[%s2194_s3 + $0xa0] ss:$8 sps:$4 sm:$0xff]  }
  0x12   :  { %2271 = vst [vmem:[#allocation19_spill] sm:$0xff] %v1720_v46  ;;  %v1730_v48 = vld [vmem:[%s2194_s3 + $0x1a0] ss:$8 sps:$4 sm:$0xff]   ;;  %v1740_v50 = vld [vmem:[%s2194_s3 + $0xb4] ss:$8 sps:$4 sm:$0xff]   ;;  %v147_v59 = vcombine.high %v139_v55, %v139_v55  ;;  %v146_v60 = vrot.slane %v132_v56, %v1733_v49 }
  0x13   :  { %497 = vmatpush1.bf16.msra.mxu1 %v1579_v18  ;;  %2272 = vst [vmem:[#allocation20_spill] sm:$0xff] %v1730_v48  ;;  %v1747_v51 = vld [vmem:[%s2194_s3 + $0x1b4] ss:$8 sps:$4 sm:$0xff]   ;;  %v1752_v52 = vld [vmem:[%s2194_s3 + $0xb0] ss:$8 sps:$4 sm:$0xff]  }
  0x14   :  { %538 = vmatpush1.bf16.msra.mxu0 %v1584_v19  ;;  %498 = vmatprep.subr.bf16.mxu1 %v1591_v20  ;;  %2273 = vst [vmem:[#allocation21_spill] sm:$0xff] %v1747_v51  ;;  %v1760_v54 = vld [vmem:[%s2194_s3 + $0x1b0] ss:$8 sps:$4 sm:$0xff]   ;;  %v1768_v57 = vld [vmem:[%s2194_s3 + $0xc4] ss:$8 sps:$4 sm:$0xff]   ;;  %v154_v63 = vpack.c.bf16 %v147_v59, %v147_v59  ;;  %v148_v36 = vcombine.high %v146_v60, %v146_v60 }
  0x15   :  { %539 = vmatprep.subr.bf16.mxu0 %v1598_v21  ;;  %2274 = vst [vmem:[#allocation22_spill] sm:$0xff] %v1760_v54  ;;  %v1775_v58 = vld [vmem:[%s2194_s3 + $0x1c4] ss:$8 sps:$4 sm:$0xff]   ;;  %v1781_v61 = vld [vmem:[%s2194_s3 + $0xc0] ss:$8 sps:$4 sm:$0xff]  }
  0x16   :  { %2275 = vst [vmem:[#allocation23_spill] sm:$0xff] %v1775_v58  ;;  %v1786_v62 = vld [vmem:[%s2194_s3 + $0x1c0] ss:$8 sps:$4 sm:$0xff]   ;;  %v1793_v37 = vld [vmem:[%s2194_s3 + $0xd4] ss:$8 sps:$4 sm:$0xff]   ;;  %v156_v42 = vpack.c.bf16 %v148_v36, %v148_v36  ;;  %520 = vmatprep.mubr.bf16.mxu1 %v154_v63 }
  0x17   :  { %499 = vmatpush1.bf16.msra.mxu1 %v1603_v22  ;;  %2276 = vst [vmem:[#allocation24_spill] sm:$0xff] %v1786_v62  ;;  %v1800_v38 = vld [vmem:[%s2194_s3 + $0x1d4] ss:$8 sps:$4 sm:$0xff]   ;;  %v1805_v53 = vld [vmem:[%s2194_s3 + $0xd0] ss:$8 sps:$4 sm:$0xff]  }
  0x18   :  { %540 = vmatpush1.bf16.msra.mxu0 %v1610_v23  ;;  %500 = vmatprep.subr.bf16.mxu1 %v1615_v24  ;;  %2277 = vst [vmem:[#allocation25_spill] sm:$0xff] %v1800_v38  ;;  %v1810_v56 = vld [vmem:[%s2194_s3 + $0x1d0] ss:$8 sps:$4 sm:$0xff]   ;;  %v1817_v59 = vld [vmem:[%s2194_s3 + $0xe4] ss:$8 sps:$4 sm:$0xff]  }
  0x19   :  { %541 = vmatprep.subr.bf16.mxu0 %v1622_v25  ;;  %2278 = vst [vmem:[#allocation26_spill] sm:$0xff] %v1810_v56  ;;  %561 = vmatprep.mubr.bf16.mxu0 %v156_v42  ;;  %v1824_v63 = vld [vmem:[%s2194_s3 + $0x1e4] ss:$8 sps:$4 sm:$0xff]   ;;  %v1829_v36 = vld [vmem:[%s2194_s3 + $0xe0] ss:$8 sps:$4 sm:$0xff]  }
  0x1a   :  { %2279 = vst [vmem:[#allocation27_spill] sm:$0xff] %v1824_v63  ;;  %v1834_v42 = vld [vmem:[%s2194_s3 + $0x1e0] ss:$8 sps:$4 sm:$0xff]  }
  0x1b   :  { %501 = vmatpush1.bf16.msra.mxu1 %v1627_v26  ;;  %2280 = vst [vmem:[#allocation28_spill] sm:$0xff] %v1834_v42 }
  0x1c   :  { %542 = vmatpush1.bf16.msra.mxu0 %v1632_v27  ;;  %502 = vmatprep.subr.bf16.mxu1 %v1639_v28 }
  0x1d   :  { %543 = vmatprep.subr.bf16.mxu0 %v1646_v29 }
  0x1f   :  { %503 = vmatpush1.bf16.msra.mxu1 %v1651_v30 }
  0x20   :  { %544 = vmatpush1.bf16.msra.mxu0 %v1658_v31  ;;  %504 = vmatprep.subr.bf16.mxu1 %v1663_v32 }
  0x21   :  { %545 = vmatprep.subr.bf16.mxu0 %v1670_v33 }
  0x23   :  { %505 = vmatpush1.bf16.msra.mxu1 %v1675_v34 }
  0x24   :  { %546 = vmatpush1.bf16.msra.mxu0 %v1680_v35  ;;  %506 = vmatprep.subr.bf16.mxu1 %v1687_v39 }
  0x25   :  { %547 = vmatprep.subr.bf16.mxu0 %v1694_v40 }
  0x27   :  { %507 = vmatpush1.bf16.msra.mxu1 %v1699_v41 }
  0x28   :  { %548 = vmatpush1.bf16.msra.mxu0 %v1708_v44  ;;  %508 = vmatprep.subr.bf16.mxu1 %v1713_v45 }
  0x29   :  { %549 = vmatprep.subr.bf16.mxu0 %v1720_v46 }
  0x2b   :  { %509 = vmatpush1.bf16.msra.mxu1 %v1725_v47 }
  0x2c   :  { %550 = vmatpush1.bf16.msra.mxu0 %v1730_v48  ;;  %510 = vmatprep.subr.bf16.mxu1 %v1740_v50 }
  0x2d   :  { %551 = vmatprep.subr.bf16.mxu0 %v1747_v51 }
  0x2f   :  { %511 = vmatpush1.bf16.msra.mxu1 %v1752_v52 }
  0x30   :  { %552 = vmatpush1.bf16.msra.mxu0 %v1760_v54  ;;  %512 = vmatprep.subr.bf16.mxu1 %v1768_v57 }
  0x31   :  { %553 = vmatprep.subr.bf16.mxu0 %v1775_v58 }
  0x33   :  { %513 = vmatpush1.bf16.msra.mxu1 %v1781_v61 }
  0x34   :  { %554 = vmatpush1.bf16.msra.mxu0 %v1786_v62  ;;  %514 = vmatprep.subr.bf16.mxu1 %v1793_v37  ;;  %v1839_v62 = vld [vmem:[%s2194_s3 + $0xf4] ss:$8 sps:$4 sm:$0xff]  }
  0x35   :  { %555 = vmatprep.subr.bf16.mxu0 %v1800_v38  ;;  %v1844_v38 = vld [vmem:[%s2194_s3 + $0x1f4] ss:$8 sps:$4 sm:$0xff]  }
  0x36   :  { %2281 = vst [vmem:[#allocation29_spill] sm:$0xff] %v1844_v38 }
  0x37   :  { %515 = vmatpush1.bf16.msra.mxu1 %v1805_v53 }
  0x38   :  { %556 = vmatpush1.bf16.msra.mxu0 %v1810_v56  ;;  %516 = vmatprep.subr.bf16.mxu1 %v1817_v59 }
  0x39   :  { %557 = vmatprep.subr.bf16.mxu0 %v1824_v63 }
  0x3a   :  { %16 = vsyncpa [#allocation5], 0  ;;  %v1855_v58 = vld [vmem:[%s2194_s3 + $0xf0] ss:$8 sps:$4 sm:$0xff]   ;;  %v1867_v63 = vld [vmem:[%s2196_s5 + $0x40] sm:$0xff]   ;;  %v155_v56 = vpack.c.bf16 %v146_v60, %v146_v60  ;;  %s1420_s24 = smov [#allocation2]  }
  0x3b   :  { %517 = vmatpush1.bf16.msra.mxu1 %v1829_v36  ;;  %v1860_v54 = vld [vmem:[%s2194_s3 + $0x1f0] ss:$8 sps:$4 sm:$0xff]   ;;  %2283 = vst [vmem:[#allocation31_spill] sm:$0xff] %v1867_v63  ;;  %v1874_v51 = vld [vmem:[%s2196_s5] sm:$0xff]   ;;  %s1031_s0 = sshll.u32 %s1420_s24, 4  ;;  %s1032_s0 = int_to_ptr.vmem [resolvable:$true] %s1031_s0 }
  0x3c   :  { %558 = vmatpush1.bf16.msra.mxu0 %v1834_v42  ;;  %2282 = vst [vmem:[#allocation30_spill] sm:$0xff] %v1860_v54  ;;  %518 = vmatprep.subr.bf16.mxu1 %v1839_v62  ;;  %v153_v42 = vpack.c.bf16 %v139_v55, %v139_v55  ;;  %2284 = vst [vmem:[#allocation32_spill] sm:$0xff] %v1874_v51  ;;  %v1887_v55 = vld [vmem:[%s2196_s5 + $0x8] sm:$0xff]   ;;  %v1894_v60 = vld [vmem:[%s2196_s5 + $0x50] sm:$0xff]  }
  0x3d   :  { %559 = vmatprep.subr.bf16.mxu0 %v1844_v38  ;;  %v1880_v38 = vld [vmem:[%s2196_s5 + $0x48] sm:$0xff]   ;;  %2286 = vst [vmem:[#allocation34_spill] sm:$0xff] %v1887_v55  ;;  %2287 = vst [vmem:[#allocation35_spill] sm:$0xff] %v1894_v60 }
  0x3e   :  { %2285 = vst [vmem:[#allocation33_spill] sm:$0xff] %v1880_v38 }
  0x3f   :  { %519 = vmatpush1.bf16.msra.mxu1 %v1855_v58 }
  0x40   :  { %560 = vmatpush1.bf16.msra.mxu0 %v1860_v54  ;;  %1147 = vmatprep.subr.bf16.mxu1 %v1867_v63 }
  0x41   :  { %1169 = vmatprep.subr.bf16.mxu0 %v1867_v63 }
  0x42   :  { %521 = vmatmul.mubr.bf16.vlgmr.msra.gmra.mrb[0].mxu1 %v153_v42  ;;  %v1908_v42 = vld [vmem:[%s2196_s5 + $0x58] sm:$0xff]  }
  0x43   :  { %562 = vmatmul.mubr.bf16.vlgmr.msra.gmra.mrb[0].mxu0 %v155_v56  ;;  %1148 = vmatpush3.bf16.msra.mxu1 %v1874_v51  ;;  %v1901_v56 = vld [vmem:[%s2196_s5 + $0x10] sm:$0xff]   ;;  %2289 = vst [vmem:[#allocation37_spill] sm:$0xff] %v1908_v42 }
  0x44   :  { %1170 = vmatpush3.bf16.msra.mxu0 %v1874_v51  ;;  %1149 = vmatprep.subr.bf16.mxu1 %v1880_v38  ;;  %2288 = vst [vmem:[#allocation36_spill] sm:$0xff] %v1901_v56 }
  0x45   :  { %1171 = vmatprep.subr.bf16.mxu0 %v1880_v38  ;;  %v1915_v38 = vld [vmem:[%s2196_s5 + $0x18] sm:$0xff]  }
  0x46   :  { %2290 = vst [vmem:[#allocation38_spill] sm:$0xff] %v1915_v38 }
  0x47   :  { %1150 = vmatpush3.bf16.msra.mxu1 %v1887_v55 }
  0x48   :  { %1172 = vmatpush3.bf16.msra.mxu0 %v1887_v55  ;;  %1151 = vmatprep.subr.bf16.mxu1 %v1894_v60  ;;  %v1922_v55 = vld [vmem:[%s2196_s5 + $0x60] sm:$0xff]  }
  0x49   :  { %1173 = vmatprep.subr.bf16.mxu0 %v1894_v60  ;;  %2291 = vst [vmem:[#allocation39_spill] sm:$0xff] %v1922_v55  ;;  %v1929_v60 = vld [vmem:[%s2196_s5 + $0x20] sm:$0xff]  }
  0x4a   :  { %2292 = vst [vmem:[#allocation40_spill] sm:$0xff] %v1929_v60 }
  0x4b   :  { %1152 = vmatpush3.bf16.msra.mxu1 %v1901_v56 }
  0x4c   :  { %1174 = vmatpush3.bf16.msra.mxu0 %v1901_v56  ;;  %1153 = vmatprep.subr.bf16.mxu1 %v1908_v42  ;;  %v1936_v56 = vld [vmem:[%s2196_s5 + $0x68] sm:$0xff]  }
  0x4d   :  { %1175 = vmatprep.subr.bf16.mxu0 %v1908_v42  ;;  %2293 = vst [vmem:[#allocation41_spill] sm:$0xff] %v1936_v56  ;;  %v1943_v42 = vld [vmem:[%s2196_s5 + $0x28] sm:$0xff]  }
  0x4e   :  { %2294 = vst [vmem:[#allocation42_spill] sm:$0xff] %v1943_v42 }
  0x4f   :  { %1154 = vmatpush3.bf16.msra.mxu1 %v1915_v38 }
  0x50   :  { %1176 = vmatpush3.bf16.msra.mxu0 %v1915_v38  ;;  %1155 = vmatprep.subr.bf16.mxu1 %v1922_v55  ;;  %v1958_v38 = vld [vmem:[%s2196_s5 + $0x30] sm:$0xff]  }
  0x51   :  { %1177 = vmatprep.subr.bf16.mxu0 %v1922_v55  ;;  %v1953_v55 = vld [vmem:[%s2196_s5 + $0x70] sm:$0xff]   ;;  %2296 = vst [vmem:[#allocation44_spill] sm:$0xff] %v1958_v38 }
  0x52   :  { %2295 = vst [vmem:[#allocation43_spill] sm:$0xff] %v1953_v55 }
  0x53   :  { %1156 = vmatpush3.bf16.msra.mxu1 %v1929_v60 }
  0x54   :  { %1178 = vmatpush3.bf16.msra.mxu0 %v1929_v60  ;;  %1157 = vmatprep.subr.bf16.mxu1 %v1936_v56  ;;  %v164_v60 = vsub.s32 1, %v1701_v43 }
  0x55   :  { %1179 = vmatprep.subr.bf16.mxu0 %v1936_v56  ;;  %v1972_v56 = vld [vmem:[%s2196_s5 + $0x38] sm:$0xff]  }
  0x56   :  { %2298 = vst [vmem:[#allocation46_spill] sm:$0xff] %v1972_v56 }
  0x57   :  { %1158 = vmatpush3.bf16.msra.mxu1 %v1943_v42 }
  0x58   :  { %1180 = vmatpush3.bf16.msra.mxu0 %v1943_v42  ;;  %1159 = vmatprep.subr.bf16.mxu1 %v1953_v55  ;;  %v1967_v42 = vld [vmem:[%s2196_s5 + $0x78] sm:$0xff]  }
  0x59   :  { %1181 = vmatprep.subr.bf16.mxu0 %v1953_v55  ;;  %2297 = vst [vmem:[#allocation45_spill] sm:$0xff] %v1967_v42  ;;  %v96_v55 = vld [vmem:[%s2195_s4] sm:$0x3] }
  0x5a   :  { %v1990_v63 = vrot.slane %v96_v55, %v164_v60 }
  0x5b   :  { %1160 = vmatpush3.bf16.msra.mxu1 %v1958_v38 }
  0x5c   :  { %1182 = vmatpush3.bf16.msra.mxu0 %v1958_v38  ;;  %1161 = vmatprep.subr.bf16.mxu1 %v1967_v42  ;;  %v160_v38 = vsub.s32 0, %v1701_v43 }
  0x5d   :  { %1183 = vmatprep.subr.bf16.mxu0 %v1967_v42  ;;  %v717_v42 = vld [vmem:[%s2192_s1] sm:$0xff] }
  0x5e   :  { %v1985_v51 = vrot.slane %v96_v55, %v160_v38 }
  0x5f   :  { %1162 = vmatpush3.bf16.msra.mxu1 %v1972_v56 }
  0x60   :  { %1184 = vmatpush3.bf16.msra.mxu0 %v1972_v56  ;;  %744 = vmatprep.subr.bf16.mxu1 %v1475_v0 }
  0x61   :  { %898 = vmatprep.subr.bf16.mxu0 %v1475_v0  ;;  %v726_v0 = vrot.slane %v717_v42, %v1733_v49 }
  0x63   :  { %v734_v27 = vcombine.high %v726_v0, %v726_v0 }
  0x65   :  { %v741_v23 = vpack.c.bf16 %v734_v27, %v734_v27  ;;  %v740_v27 = vpack.c.bf16 %v726_v0, %v726_v0  ;;  %v2309_v0 = vld [vmem:[#allocation19_spill] sm:$0xff] }
 0x115   :  { %v522_v56 = vpop.f32.mrb[0].mxu1 }
 0x116   :  { %v563_v54 = vpop.f32.mrb[0].mxu0  ;;  %v523_v48 = vadd.f32 %v522_v56, %v1985_v51  ;;  %v524_v46 = vpop.f32.mrb[1].mxu1  ;;  %v2307_v56 = vld [vmem:[#allocation17_spill] sm:$0xff] }
 0x117   :  { %v565_v44 = vpop.f32.mrb[1].mxu0  ;;  %v525_v40 = vadd.f32 %v524_v46, %v1990_v63  ;;  %v526_v35 = vpop.f32.mrb[2].mxu1  ;;  %v2304_v46 = vld [vmem:[#allocation14_spill] sm:$0xff] }
 0x118   :  { %v567_v43 = vpop.f32.mrb[2].mxu0  ;;  %v564_v38 = vadd.f32 %v563_v54, %v523_v48  ;;  %v527_v33 = vpop.f32.mrb[3].mxu1  ;;  %v2301_v35 = vld [vmem:[#allocation11_spill] sm:$0xff]  ;;  %v2306_v54 = vld [vmem:[#allocation16_spill] sm:$0xff] }
 0x119   :  { %v568_v31 = vpop.f32.mrb[3].mxu0  ;;  %v566_v29 = vadd.f32 %v565_v44, %v525_v40  ;;  %v2300_v33 = vld [vmem:[#allocation10_spill] sm:$0xff]  ;;  %v2302_v40 = vld [vmem:[#allocation12_spill] sm:$0xff]  ;;  %v2303_v44 = vld [vmem:[#allocation13_spill] sm:$0xff] }
 0x11a   :  { %v570_v25 = vmax.f32 %v564_v38, 0.0  ;;  %v2299_v31 = vld [vmem:[#allocation9_spill] sm:$0xff]  ;;  %v2305_v48 = vld [vmem:[#allocation15_spill] sm:$0xff]  ;;  %v2310_v43 = vld [vmem:[#allocation20_spill] sm:$0xff] }
 0x11b   :  { %v571_v55 = vmax.f32 %v566_v29, 0.0  ;;  %v2311_v38 = vld [vmem:[#allocation21_spill] sm:$0xff] }
 0x11c   :  { %v572_v21 = vpack.c.bf16 %v570_v25, %v570_v25 }
 0x11d   :  { %v573_v60 = vpack.c.bf16 %v571_v55, %v571_v55  ;;  %v2312_v55 = vld [vmem:[#allocation22_spill] sm:$0xff] }
 0x11f   :  { %708 = vmatprep.mubr.bf16.mxu1 %v573_v60  ;;  %v2313_v60 = vld [vmem:[#allocation23_spill] sm:$0xff] }
 0x120   :  { %709 = vmatmul.mubr.bf16.vlgmr.msra.gmra.mrb[4].mxu1 %v572_v21  ;;  %v719_v21 = vcombine.high %v717_v42, %v717_v42  ;;  %v2308_v42 = vld [vmem:[#allocation18_spill] sm:$0xff] }
 0x121   :  { %745 = vmatpush1.bf16.msra.mxu1 %v1486_v2  ;;  %776 = vmatprep.mubr.bf16.mxu1 %v741_v23 }
 0x122   :  { %746 = vmatprep.subr.bf16.mxu1 %v1497_v4  ;;  %v733_v23 = vrot.slane %v719_v21, %v1733_v49  ;;  %v2314_v21 = vld [vmem:[#allocation24_spill] sm:$0xff] }
 0x124   :  { %v735_v25 = vcombine.high %v733_v23, %v733_v23 }
 0x125   :  { %747 = vmatpush1.bf16.msra.mxu1 %v1509_v6 }
 0x126   :  { %748 = vmatprep.subr.bf16.mxu1 %v1521_v8  ;;  %v743_v29 = vpack.c.bf16 %v735_v25, %v735_v25  ;;  %v2315_v25 = vld [vmem:[#allocation25_spill] sm:$0xff] }
 0x129   :  { %749 = vmatpush1.bf16.msra.mxu1 %v1531_v10 }
 0x12a   :  { %750 = vmatprep.subr.bf16.mxu1 %v1543_v12 }
 0x12d   :  { %751 = vmatpush1.bf16.msra.mxu1 %v1555_v14 }
 0x12e   :  { %752 = vmatprep.subr.bf16.mxu1 %v1567_v16 }
 0x131   :  { %753 = vmatpush1.bf16.msra.mxu1 %v1579_v18 }
 0x132   :  { %754 = vmatprep.subr.bf16.mxu1 %v1591_v20 }
 0x135   :  { %755 = vmatpush1.bf16.msra.mxu1 %v1603_v22 }
 0x136   :  { %756 = vmatprep.subr.bf16.mxu1 %v1615_v24 }
 0x139   :  { %757 = vmatpush1.bf16.msra.mxu1 %v1627_v26 }
 0x13a   :  { %758 = vmatprep.subr.bf16.mxu1 %v1639_v28 }
 0x13d   :  { %759 = vmatpush1.bf16.msra.mxu1 %v1651_v30 }
 0x13e   :  { %760 = vmatprep.subr.bf16.mxu1 %v1663_v32 }
 0x141   :  { %761 = vmatpush1.bf16.msra.mxu1 %v1675_v34 }
 0x142   :  { %762 = vmatprep.subr.bf16.mxu1 %v1687_v39 }
 0x145   :  { %763 = vmatpush1.bf16.msra.mxu1 %v1699_v41 }
 0x146   :  { %764 = vmatprep.subr.bf16.mxu1 %v1713_v45 }
 0x149   :  { %765 = vmatpush1.bf16.msra.mxu1 %v1725_v47 }
 0x14a   :  { %766 = vmatprep.subr.bf16.mxu1 %v1740_v50 }
 0x14d   :  { %767 = vmatpush1.bf16.msra.mxu1 %v1752_v52 }
 0x14e   :  { %768 = vmatprep.subr.bf16.mxu1 %v1768_v57 }
 0x151   :  { %769 = vmatpush1.bf16.msra.mxu1 %v1781_v61 }
 0x152   :  { %770 = vmatprep.subr.bf16.mxu1 %v1793_v37 }
 0x155   :  { %771 = vmatpush1.bf16.msra.mxu1 %v1805_v53 }
 0x156   :  { %772 = vmatprep.subr.bf16.mxu1 %v1817_v59 }
 0x159   :  { %773 = vmatpush1.bf16.msra.mxu1 %v1829_v36 }
 0x15a   :  { %774 = vmatprep.subr.bf16.mxu1 %v1839_v62 }
 0x15d   :  { %775 = vmatpush1.bf16.msra.mxu1 %v1855_v58 }
 0x15e   :  { %785 = vmatprep.subr.bf16.mxu1 %v1480_v1 }
 0x160   :  { %777 = vmatmul.mubr.bf16.vlgmr.msra.gmra.mrb[8].mxu1 %v740_v27  ;;  %v2316_v27 = vld [vmem:[#allocation26_spill] sm:$0xff] }
 0x161   :  { %786 = vmatpush1.bf16.msra.mxu1 %v1491_v3  ;;  %817 = vmatprep.mubr.bf16.mxu1 %v743_v29  ;;  %v2317_v29 = vld [vmem:[#allocation27_spill] sm:$0xff] }
 0x162   :  { %787 = vmatprep.subr.bf16.mxu1 %v1504_v5 }
 0x165   :  { %788 = vmatpush1.bf16.msra.mxu1 %v1515_v7 }
 0x166   :  { %789 = vmatprep.subr.bf16.mxu1 %v1526_v9 }
 0x169   :  { %790 = vmatpush1.bf16.msra.mxu1 %v1536_v11 }
 0x16a   :  { %791 = vmatprep.subr.bf16.mxu1 %v1550_v13 }
 0x16d   :  { %792 = vmatpush1.bf16.msra.mxu1 %v1562_v15 }
 0x16e   :  { %793 = vmatprep.subr.bf16.mxu1 %v1574_v17 }
 0x171   :  { %794 = vmatpush1.bf16.msra.mxu1 %v1584_v19 }
 0x172   :  { %795 = vmatprep.subr.bf16.mxu1 %v2299_v31 }
 0x175   :  { %796 = vmatpush1.bf16.msra.mxu1 %v2300_v33 }
 0x176   :  { %797 = vmatprep.subr.bf16.mxu1 %v2301_v35 }
 0x179   :  { %798 = vmatpush1.bf16.msra.mxu1 %v2302_v40 }
 0x17a   :  { %799 = vmatprep.subr.bf16.mxu1 %v2303_v44 }
 0x17d   :  { %800 = vmatpush1.bf16.msra.mxu1 %v2304_v46 }
 0x17e   :  { %801 = vmatprep.subr.bf16.mxu1 %v2305_v48 }
 0x181   :  { %802 = vmatpush1.bf16.msra.mxu1 %v2306_v54 }
 0x182   :  { %803 = vmatprep.subr.bf16.mxu1 %v2307_v56  ;;  %v2318_v56 = vld [vmem:[#allocation28_spill] sm:$0xff] }
 0x185   :  { %804 = vmatpush1.bf16.msra.mxu1 %v2308_v42  ;;  %v2319_v42 = vld [vmem:[#allocation29_spill] sm:$0xff] }
 0x186   :  { %805 = vmatprep.subr.bf16.mxu1 %v2309_v0  ;;  %v742_v0 = vpack.c.bf16 %v733_v23, %v733_v23  ;;  %v2329_v23 = vld [vmem:[#allocation39_spill] sm:$0xff] }
 0x189   :  { %806 = vmatpush1.bf16.msra.mxu1 %v2310_v43  ;;  %v2320_v43 = vld [vmem:[#allocation30_spill] sm:$0xff] }
 0x18a   :  { %807 = vmatprep.subr.bf16.mxu1 %v2311_v38  ;;  %v2321_v38 = vld [vmem:[#allocation31_spill] sm:$0xff] }
 0x18d   :  { %808 = vmatpush1.bf16.msra.mxu1 %v2312_v55  ;;  %v2322_v55 = vld [vmem:[#allocation32_spill] sm:$0xff] }
 0x18e   :  { %809 = vmatprep.subr.bf16.mxu1 %v2313_v60  ;;  %v2323_v60 = vld [vmem:[#allocation33_spill] sm:$0xff] }
 0x191   :  { %810 = vmatpush1.bf16.msra.mxu1 %v2314_v21  ;;  %v2324_v21 = vld [vmem:[#allocation34_spill] sm:$0xff] }
 0x192   :  { %811 = vmatprep.subr.bf16.mxu1 %v2315_v25  ;;  %v2325_v25 = vld [vmem:[#allocation35_spill] sm:$0xff] }
 0x195   :  { %812 = vmatpush1.bf16.msra.mxu1 %v2316_v27  ;;  %v2326_v27 = vld [vmem:[#allocation36_spill] sm:$0xff] }
 0x196   :  { %813 = vmatprep.subr.bf16.mxu1 %v2317_v29  ;;  %v2327_v29 = vld [vmem:[#allocation37_spill] sm:$0xff] }
 0x199   :  { %814 = vmatpush1.bf16.msra.mxu1 %v2318_v56  ;;  %v2328_v56 = vld [vmem:[#allocation38_spill] sm:$0xff] }
 0x19a   :  { %815 = vmatprep.subr.bf16.mxu1 %v2319_v42 }
 0x19d   :  { %816 = vmatpush1.bf16.msra.mxu1 %v2320_v43  ;;  %v2330_v43 = vld [vmem:[#allocation40_spill] sm:$0xff] }
 0x19e   :  { %1191 = vmatprep.subr.bf16.mxu1 %v2321_v38  ;;  %v2331_v38 = vld [vmem:[#allocation41_spill] sm:$0xff] }
 0x1a0   :  { %818 = vmatmul.mubr.bf16.vlgmr.msra.gmra.mrb[8].mxu1 %v742_v0  ;;  %v2332_v0 = vld [vmem:[#allocation42_spill] sm:$0xff] }
 0x1a1   :  { %1192 = vmatpush3.bf16.msra.mxu1 %v2322_v55  ;;  %v2333_v55 = vld [vmem:[#allocation43_spill] sm:$0xff] }
 0x1a2   :  { %1193 = vmatprep.subr.bf16.mxu1 %v2323_v60  ;;  %v2334_v60 = vld [vmem:[#allocation44_spill] sm:$0xff] }
 0x1a5   :  { %1194 = vmatpush3.bf16.msra.mxu1 %v2324_v21  ;;  %v2335_v21 = vld [vmem:[#allocation45_spill] sm:$0xff] }
 0x1a6   :  { %1195 = vmatprep.subr.bf16.mxu1 %v2325_v25  ;;  %v2336_v25 = vld [vmem:[#allocation46_spill] sm:$0xff] }
 0x1a9   :  { %1196 = vmatpush3.bf16.msra.mxu1 %v2326_v27 }
 0x1aa   :  { %1197 = vmatprep.subr.bf16.mxu1 %v2327_v29 }
 0x1ad   :  { %1198 = vmatpush3.bf16.msra.mxu1 %v2328_v56  ;;  %v2078_v56 = vld [vmem:[%s2197_s6] ss:$0 sm:$0xff] }
 0x1ae   :  { %1199 = vmatprep.subr.bf16.mxu1 %v2329_v23 }
 0x1b1   :  { %1200 = vmatpush3.bf16.msra.mxu1 %v2330_v43 }
 0x1b2   :  { %1201 = vmatprep.subr.bf16.mxu1 %v2331_v38 }
 0x1b5   :  { %1202 = vmatpush3.bf16.msra.mxu1 %v2332_v0 }
 0x1b6   :  { %1203 = vmatprep.subr.bf16.mxu1 %v2333_v55  ;;  %v871_v55 = vld [vmem:[%s2193_s2] sm:$0xff]  ;;  %s1419_s2 = smov [#allocation4]  }
 0x1b7   :  { %s1041_s6 = sshll.u32 %s1419_s2, 4  ;;  %s1042_s6 = int_to_ptr.vmem [resolvable:$true] %s1041_s6 }
 0x1b8   :  { %s1348_s25 = scalar_lea.vmem %s1042_s6, 32  ;;  %p1353_p1 = scmp.lt.s32.totalorder %s1042_s6, %s1042_s6 }
 0x1b9   :  { %1204 = vmatpush3.bf16.msra.mxu1 %v2334_v60  ;;  %v880_v60 = vrot.slane %v871_v55, %v1733_v49  ;;  %p1349_p0 = scmp.ne.s32.totalorder %s1042_s6, %s1348_s25  ;;  %p1354_p2 = scmp.lt.s32.totalorder %s1348_s25, %s1348_s25 }
 0x1ba   :  { %1205 = vmatprep.subr.bf16.mxu1 %v2335_v21 }
 0x1bb   :  { %v888_v46 = vcombine.high %v880_v60, %v880_v60  ;;  %p1355_p3 = por %p1354_p2, %p1353_p1 }
 0x1bd   :  { %1206 = vmatpush3.bf16.msra.mxu1 %v2336_v25  ;;  %p1356_p4 = pnand %p1355_p3, %p1349_p0 }
 0x1f3   :  { %v1163_v27 = vpop.f32.mrb[4].mxu1 }
 0x1f4   :  { %v1164_v29 = vpop.f32.mrb[5].mxu1 }
 0x1f5   :  { %v1165_v43 = vadd.f32 %v1164_v29, %v1163_v27  ;;  %v1166_v23 = vpop.f32.mrb[6].mxu1 }
 0x1f6   :  { %v1167_v38 = vpop.f32.mrb[7].mxu1 }
 0x1f7   :  { %v711_v0 = vadd.f32 %v1165_v43, %v2078_v56  ;;  %v895_v43 = vpack.c.bf16 %v888_v46, %v888_v46 }
 0x1f9   :  { %716 = vst [vmem:[#allocation2] sm:$0x3] %v711_v0 }
 0x273   :  { %v819_v21 = vpop.f32.mrb[8].mxu1 }
 0x274   :  { %v1217_v25 = vadd.f32 %v819_v21, %v1985_v51  ;;  %v821_v42 = vpop.f32.mrb[9].mxu1 }
 0x275   :  { %v1218_v54 = vadd.f32 %v821_v42, %v1990_v63  ;;  %v823_v48 = vpop.f32.mrb[10].mxu1 }
 0x276   :  { %v826_v27 = vmax.f32 %v1217_v25, 0.0  ;;  %v824_v29 = vpop.f32.mrb[11].mxu1 }
 0x277   :  { %v827_v23 = vmax.f32 %v1218_v54, 0.0 }
 0x278   :  { %v828_v0 = vpack.c.bf16 %v826_v27, %v826_v27 }
 0x279   :  { %v829_v38 = vpack.c.bf16 %v827_v23, %v827_v23 }
 0x27b   :  { %862 = vmatprep.mubr.bf16.mxu0 %v829_v38 }
 0x27c   :  { %863 = vmatmul.mubr.bf16.vlgmr.msra.gmra.mrb[4].mxu0 %v828_v0 }
 0x27d   :  { %899 = vmatpush1.bf16.msra.mxu0 %v1486_v2  ;;  %930 = vmatprep.mubr.bf16.mxu0 %v895_v43  ;;  %v873_v2 = vcombine.high %v871_v55, %v871_v55 }
 0x27e   :  { %900 = vmatprep.subr.bf16.mxu0 %v1497_v4 }
 0x27f   :  { %v887_v4 = vrot.slane %v873_v2, %v1733_v49 }
 0x281   :  { %901 = vmatpush1.bf16.msra.mxu0 %v1509_v6  ;;  %v889_v6 = vcombine.high %v887_v4, %v887_v4 }
 0x282   :  { %902 = vmatprep.subr.bf16.mxu0 %v1521_v8  ;;  %v894_v8 = vpack.c.bf16 %v880_v60, %v880_v60 }
 0x285   :  { %903 = vmatpush1.bf16.msra.mxu0 %v1531_v10  ;;  %v897_v10 = vpack.c.bf16 %v889_v6, %v889_v6 }
 0x286   :  { %904 = vmatprep.subr.bf16.mxu0 %v1543_v12  ;;  %v2343_v12 = vld [vmem:[#allocation20_spill] sm:$0xff] }
 0x289   :  { %905 = vmatpush1.bf16.msra.mxu0 %v1555_v14  ;;  %v2345_v14 = vld [vmem:[#allocation22_spill] sm:$0xff] }
 0x28a   :  { %906 = vmatprep.subr.bf16.mxu0 %v1567_v16  ;;  %v2347_v16 = vld [vmem:[#allocation24_spill] sm:$0xff] }
 0x28d   :  { %907 = vmatpush1.bf16.msra.mxu0 %v1579_v18  ;;  %v2349_v18 = vld [vmem:[#allocation26_spill] sm:$0xff] }
 0x28e   :  { %908 = vmatprep.subr.bf16.mxu0 %v1591_v20  ;;  %v2351_v20 = vld [vmem:[#allocation28_spill] sm:$0xff] }
 0x291   :  { %909 = vmatpush1.bf16.msra.mxu0 %v1603_v22  ;;  %v2352_v22 = vld [vmem:[#allocation29_spill] sm:$0xff] }
 0x292   :  { %910 = vmatprep.subr.bf16.mxu0 %v1615_v24  ;;  %v896_v24 = vpack.c.bf16 %v887_v4, %v887_v4 }
 0x295   :  { %911 = vmatpush1.bf16.msra.mxu0 %v1627_v26  ;;  %v2353_v26 = vld [vmem:[#allocation30_spill] sm:$0xff] }
 0x296   :  { %912 = vmatprep.subr.bf16.mxu0 %v1639_v28 }
 0x299   :  { %913 = vmatpush1.bf16.msra.mxu0 %v1651_v30 }
 0x29a   :  { %914 = vmatprep.subr.bf16.mxu0 %v1663_v32 }
 0x29d   :  { %915 = vmatpush1.bf16.msra.mxu0 %v1675_v34 }
 0x29e   :  { %916 = vmatprep.subr.bf16.mxu0 %v1687_v39 }
 0x2a1   :  { %917 = vmatpush1.bf16.msra.mxu0 %v1699_v41 }
 0x2a2   :  { %918 = vmatprep.subr.bf16.mxu0 %v1713_v45 }
 0x2a5   :  { %919 = vmatpush1.bf16.msra.mxu0 %v1725_v47 }
 0x2a6   :  { %920 = vmatprep.subr.bf16.mxu0 %v1740_v50 }
 0x2a9   :  { %921 = vmatpush1.bf16.msra.mxu0 %v1752_v52 }
 0x2aa   :  { %922 = vmatprep.subr.bf16.mxu0 %v1768_v57 }
 0x2ad   :  { %923 = vmatpush1.bf16.msra.mxu0 %v1781_v61 }
 0x2ae   :  { %924 = vmatprep.subr.bf16.mxu0 %v1793_v37 }
 0x2b1   :  { %925 = vmatpush1.bf16.msra.mxu0 %v1805_v53 }
 0x2b2   :  { %926 = vmatprep.subr.bf16.mxu0 %v1817_v59 }
 0x2b5   :  { %927 = vmatpush1.bf16.msra.mxu0 %v1829_v36 }
 0x2b6   :  { %928 = vmatprep.subr.bf16.mxu0 %v1839_v62 }
 0x2b9   :  { %929 = vmatpush1.bf16.msra.mxu0 %v1855_v58 }
 0x2ba   :  { %939 = vmatprep.subr.bf16.mxu0 %v1480_v1  ;;  %v2337_v1 = vld [vmem:[#allocation14_spill] sm:$0xff] }
 0x2bc   :  { %931 = vmatmul.mubr.bf16.vlgmr.msra.gmra.mrb[8].mxu0 %v894_v8 }
 0x2bd   :  { %940 = vmatpush1.bf16.msra.mxu0 %v1491_v3  ;;  %971 = vmatprep.mubr.bf16.mxu0 %v897_v10  ;;  %v2338_v3 = vld [vmem:[#allocation15_spill] sm:$0xff] }
 0x2be   :  { %941 = vmatprep.subr.bf16.mxu0 %v1504_v5  ;;  %v2339_v5 = vld [vmem:[#allocation16_spill] sm:$0xff] }
 0x2c1   :  { %942 = vmatpush1.bf16.msra.mxu0 %v1515_v7  ;;  %v2340_v7 = vld [vmem:[#allocation17_spill] sm:$0xff] }
 0x2c2   :  { %943 = vmatprep.subr.bf16.mxu0 %v1526_v9  ;;  %v2341_v9 = vld [vmem:[#allocation18_spill] sm:$0xff] }
 0x2c5   :  { %944 = vmatpush1.bf16.msra.mxu0 %v1536_v11  ;;  %v2342_v11 = vld [vmem:[#allocation19_spill] sm:$0xff] }
 0x2c6   :  { %945 = vmatprep.subr.bf16.mxu0 %v1550_v13  ;;  %v2344_v13 = vld [vmem:[#allocation21_spill] sm:$0xff] }
 0x2c9   :  { %946 = vmatpush1.bf16.msra.mxu0 %v1562_v15  ;;  %v2346_v15 = vld [vmem:[#allocation23_spill] sm:$0xff] }
 0x2ca   :  { %947 = vmatprep.subr.bf16.mxu0 %v1574_v17  ;;  %v2348_v17 = vld [vmem:[#allocation25_spill] sm:$0xff] }
 0x2cd   :  { %948 = vmatpush1.bf16.msra.mxu0 %v1584_v19  ;;  %v2350_v19 = vld [vmem:[#allocation27_spill] sm:$0xff] }
 0x2ce   :  { %949 = vmatprep.subr.bf16.mxu0 %v2299_v31 }
 0x2d1   :  { %950 = vmatpush1.bf16.msra.mxu0 %v2300_v33 }
 0x2d2   :  { %951 = vmatprep.subr.bf16.mxu0 %v2301_v35 }
 0x2d5   :  { %952 = vmatpush1.bf16.msra.mxu0 %v2302_v40 }
 0x2d6   :  { %953 = vmatprep.subr.bf16.mxu0 %v2303_v44 }
 0x2d9   :  { %954 = vmatpush1.bf16.msra.mxu0 %v2337_v1 }
 0x2da   :  { %955 = vmatprep.subr.bf16.mxu0 %v2338_v3 }
 0x2dd   :  { %956 = vmatpush1.bf16.msra.mxu0 %v2339_v5 }
 0x2de   :  { %957 = vmatprep.subr.bf16.mxu0 %v2340_v7 }
 0x2e1   :  { %958 = vmatpush1.bf16.msra.mxu0 %v2341_v9 }
 0x2e2   :  { %959 = vmatprep.subr.bf16.mxu0 %v2342_v11 }
 0x2e5   :  { %960 = vmatpush1.bf16.msra.mxu0 %v2343_v12 }
 0x2e6   :  { %961 = vmatprep.subr.bf16.mxu0 %v2344_v13 }
 0x2e9   :  { %962 = vmatpush1.bf16.msra.mxu0 %v2345_v14 }
 0x2ea   :  { %963 = vmatprep.subr.bf16.mxu0 %v2346_v15 }
 0x2ed   :  { %964 = vmatpush1.bf16.msra.mxu0 %v2347_v16 }
 0x2ee   :  { %965 = vmatprep.subr.bf16.mxu0 %v2348_v17 }
 0x2f1   :  { %966 = vmatpush1.bf16.msra.mxu0 %v2349_v18 }
 0x2f2   :  { %967 = vmatprep.subr.bf16.mxu0 %v2350_v19 }
 0x2f5   :  { %968 = vmatpush1.bf16.msra.mxu0 %v2351_v20 }
 0x2f6   :  { %969 = vmatprep.subr.bf16.mxu0 %v2352_v22 }
 0x2f9   :  { %970 = vmatpush1.bf16.msra.mxu0 %v2353_v26 }
 0x2fc   :  { %972 = vmatmul.mubr.bf16.vlgmr.msra.gmra.mrb[8].mxu0 %v896_v24 }
 0x34f   :  { %v1185_v28 = vpop.f32.mrb[4].mxu0 }
 0x350   :  { %v1186_v30 = vpop.f32.mrb[5].mxu0 }
 0x351   :  { %v1187_v32 = vadd.f32 %v1186_v30, %v1185_v28  ;;  %v1188_v34 = vpop.f32.mrb[6].mxu0 }
 0x352   :  { %v1189_v39 = vpop.f32.mrb[7].mxu0 }
 0x353   :  { %v865_v41 = vadd.f32 %v1187_v32, %v2078_v56 }
 0x355   :  { %870 = vst [vmem:[#allocation4] sm:$0x3] %v865_v41 }
 0x3cf   :  { %v973_v45 = vpop.f32.mrb[8].mxu0 }
 0x3d0   :  { %v1219_v47 = vadd.f32 %v973_v45, %v1985_v51  ;;  %v975_v49 = vpop.f32.mrb[9].mxu0 }
 0x3d1   :  { %v1220_v50 = vadd.f32 %v975_v49, %v1990_v63  ;;  %v977_v52 = vpop.f32.mrb[10].mxu0 }
 0x3d2   :  { %v980_v57 = vmax.f32 %v1219_v47, 0.0  ;;  %v978_v58 = vpop.f32.mrb[11].mxu0 }
 0x3d3   :  { %v981_v61 = vmax.f32 %v1220_v50, 0.0 }
 0x3d4   :  { %v982_v37 = vpack.c.bf16 %v980_v57, %v980_v57 }
 0x3d5   :  { %v983_v62 = vpack.c.bf16 %v981_v61, %v981_v61 }
 0x3d7   :  { %1016 = vmatprep.mubr.bf16.mxu1 %v983_v62 }
 0x3d8   :  { %1017 = vmatmul.mubr.bf16.vlgmr.msra.gmra.mrb[12].mxu1 %v982_v37 }
 0x3d9   :  { %1359 = shalt.err (!%p1356_p4)
}
 0x3da   :  { %s1360_s28 = scalar_lea.hbm %s2199_s8, 32 }
 0x3db   :  { %p1361_p5 = scmp.ne.s32.totalorder %s2199_s8, %s1360_s28  ;;  %p1364_p6 = scmp.lt.u32.totalorder %s1360_s28, %s2199_s8 }
 0x3dd   :  { %p1366_p7 = pnand %p1364_p6, %p1361_p5 }
 0x3df   :  { %1369 = shalt.err (!%p1366_p7)
}
 0x3e0   :  { %1044 = dma.vmem_to_hbm [thread:$0]  %s1042_s6, 32, %s2199_s8, [#allocation5]  }
 0x3e1   :  { %s1370_s14 = scalar_lea.vmem %s1032_s0, 32  ;;  %p1375_p9 = scmp.lt.s32.totalorder %s1032_s0, %s1032_s0 }
 0x3e2   :  { %p1371_p8 = scmp.ne.s32.totalorder %s1032_s0, %s1370_s14  ;;  %p1376_p10 = scmp.lt.s32.totalorder %s1370_s14, %s1370_s14 }
 0x3e4   :  { %p1377_p11 = por %p1376_p10, %p1375_p9 }
 0x3e6   :  { %p1378_p12 = pnand %p1377_p11, %p1371_p8 }
 0x3e8   :  { %1381 = shalt.err (!%p1378_p12)
}
 0x3e9   :  { %s1382_s16 = scalar_lea.hbm %s2198_s7, 32 }
 0x3ea   :  { %p1383_p13 = scmp.ne.s32.totalorder %s2198_s7, %s1382_s16  ;;  %p1386_p0 = scmp.lt.u32.totalorder %s1382_s16, %s2198_s7 }
 0x3ec   :  { %p1388_p1 = pnand %p1386_p0, %p1383_p13 }
 0x3ee   :  { %1391 = shalt.err (!%p1388_p1)
}
 0x3ef   :  { %1034 = dma.vmem_to_hbm [thread:$0]  %s1032_s0, 32, %s2198_s7, [#allocation3]  }
 0x3f0   :  { %s1421_s21 = smov [#allocation6]  }
 0x3f1   :  { %s1051_s1 = sshll.u32 %s1421_s21, 4  ;;  %s1052_s1 = int_to_ptr.vmem [resolvable:$true] %s1051_s1 }
 0x3f2   :  { %s1392_s4 = scalar_lea.vmem %s1052_s1, 32  ;;  %p1397_p3 = scmp.lt.s32.totalorder %s1052_s1, %s1052_s1 }
 0x3f3   :  { %p1393_p2 = scmp.ne.s32.totalorder %s1052_s1, %s1392_s4  ;;  %p1398_p4 = scmp.lt.s32.totalorder %s1392_s4, %s1392_s4 }
 0x3f5   :  { %p1399_p5 = por %p1398_p4, %p1397_p3 }
 0x3f7   :  { %p1400_p6 = pnand %p1399_p5, %p1393_p2 }
 0x4ab   :  { %v1207_v51 = vpop.f32.mrb[12].mxu1 }
 0x4ac   :  { %v1208_v53 = vpop.f32.mrb[13].mxu1 }
 0x4ad   :  { %v1209_v59 = vadd.f32 %v1208_v53, %v1207_v51  ;;  %v1210_v63 = vpop.f32.mrb[14].mxu1 }
 0x4ae   :  { %v1211_v36 = vpop.f32.mrb[15].mxu1 }
 0x4af   :  { %v1019_v31 = vadd.f32 %v1209_v59, %v2078_v56 }
 0x4b1   :  { %1024 = vst [vmem:[#allocation6] sm:$0x3] %v1019_v31 }
 0x4b2   :  { %1403 = shalt.err (!%p1400_p6)
}
 0x4b3   :  { %s1404_s23 = scalar_lea.hbm %s2200_s9, 32 }
 0x4b4   :  { %p1405_p7 = scmp.ne.s32.totalorder %s2200_s9, %s1404_s23  ;;  %p1408_p8 = scmp.lt.u32.totalorder %s1404_s23, %s2200_s9 }
 0x4b6   :  { %p1410_p9 = pnand %p1408_p8, %p1405_p7 }
 0x4b8   :  { %1413 = shalt.err (!%p1410_p9)
}
 0x4b9   :  { %1054 = dma.vmem_to_hbm [thread:$0]  %s1052_s1, 32, %s2200_s9, [#allocation5]  }
 0x4ba   :  { %1414 = dma.done.wait [#allocation3], 32  }
 0x4bb   :  { %1415 = vsyncadd [#allocation3], 4294967264 }
 0x4bc   :  { %1416 = dma.done.wait [#allocation5], 64  }
 0x4bd   :  { %1417 = vsyncadd [#allocation5], 4294967232 }
 0x4be   :  { %1064 = vsyncpa [#allocation3], 1 }
 0x4bf   :  { %1065 = vsyncpa [#allocation5], 1 }

</bundles_post_ra>
